<compile_context>
chip_gen: v7x
topology: tpu7x:2x2x1
jax: 0.10.0
libtpu: 0.0.40
codegen_flags: <defaults>
</compile_context>

<pallas_src>
import functools

import jax
import jax.numpy as jnp
from jax import lax
from jax.experimental import pallas as pl
from jax.experimental.pallas import tpu as pltpu


def _round_up(x, m):
    return ((x + m - 1) // m) * m


def gru_recurrence_kernel(g_ref, wh_ref, h0_ref, out_ref, h_scratch, *,
                          tb, h_pad, seq_len, guard_tail):
    """One grid step == `tb` GRU time steps for one batch block.

    g_ref     : (tb, bb, 2*h_pad)  hoisted x@[W_iz|W_in] + summed biases
                                   (compute_dtype, lane-padded)
    wh_ref    : (h_pad, 2*h_pad)   fused [W_hz | W_hn] (constant index map)
    h0_ref    : (bb, h_pad)        initial hidden state (f32)
    out_ref   : (tb, bb, h_pad)    hidden state at each step (f32)
    h_scratch : (bb, h_pad)        hidden state carried across time blocks
    """
    tidx = pl.program_id(1)                      # serial (arbitrary) time axis

    @pl.when(tidx == 0)
    def _():
        h_scratch[...] = h0_ref[...]

    wh = wh_ref[...]                             # resident fused hidden weights
    t0 = tidx * tb

    def step(s, h):
        # Single fused MXU matmul per time step (bf16 operands, f32 accum).
        gates = g_ref[s].astype(jnp.float32) + jnp.dot(
            h.astype(wh.dtype), wh, preferred_element_type=jnp.float32)
        z = jax.nn.sigmoid(gates[:, :h_pad])     # update gate  (lane-aligned)
        n = jnp.tanh(gates[:, h_pad:])           # candidate    (lane-aligned)
        hy = h + z * (n - h)                     # == (1-z)*h + z*n

        if guard_tail:
            in_range = (t0 + s) < seq_len
            hy = jnp.where(in_range, hy, h)      # keep h_scratch valid on pad

            @pl.when(in_range)
            def _():
                out_ref[s] = hy.astype(out_ref.dtype)
        else:
            out_ref[s] = hy.astype(out_ref.dtype)
        return hy

    # Fully unrolled inner loop over the time block (LLO scheduler visibility).
    h_final = lax.fori_loop(0, tb, step, h_scratch[...], unroll=True)
    h_scratch[...] = h_final


def custom_gru_forward(x, params, hx=None, *, time_block=32, batch_block=None,
                       compute_dtype=jnp.bfloat16):
    """x: (T, B, I) float32, seq-major (like the PyTorch module).

    Returns (output (T, B, H), h_last (B, H)), both float32.
    """
    T, B, I = x.shape
    H = params["W_hz"].shape[0]
    if hx is None:
        hx = jnp.zeros((B, H), dtype=jnp.float32)
    if T == 0:
        return jnp.zeros((0, B, H), jnp.float32), hx.astype(jnp.float32)

    # ---- lane-dense padding: hidden dim up to a multiple of 128 ------------
    h_pad = _round_up(H, 128)
    # batch blocking (leading "parallel" grid axis; shards across TCs on v7x)
    b_min = _round_up(B, 8)
    bb = b_min if batch_block is None else _round_up(min(int(batch_block), b_min), 8)
    b_pad = _round_up(b_min, bb)

    # ---- hoisted, time-independent work: one big GEMM + pre-summed biases --
    x_f32 = x.astype(jnp.float32)
    w_i = jnp.zeros((I, 2 * h_pad), jnp.float32)
    w_i = w_i.at[:, :H].set(params["W_iz"])
    w_i = w_i.at[:, h_pad:h_pad + H].set(params["W_in"])
    bias = jnp.zeros((1, 2 * h_pad), jnp.float32)
    bias = bias.at[:, :H].set(params["b_iz"] + params["b_hz"])
    bias = bias.at[:, h_pad:h_pad + H].set(params["b_in"] + params["b_hn"])
    g = (jnp.einsum("tbi,ih->tbh", x_f32, w_i) + bias).astype(compute_dtype)

    w_h = jnp.zeros((h_pad, 2 * h_pad), jnp.float32)
    w_h = w_h.at[:H, :H].set(params["W_hz"])
    w_h = w_h.at[:H, h_pad:h_pad + H].set(params["W_hn"])
    w_h = w_h.astype(compute_dtype)              # pad rows are zero -> no leak

    h0 = jnp.zeros((b_pad, h_pad), jnp.float32)
    h0 = h0.at[:B, :H].set(hx.astype(jnp.float32))

    # ---- block the time axis; pad T / B to the block sizes -----------------
    tb = max(1, min(int(time_block), T))
    t_pad = pl.cdiv(T, tb) * tb
    guard_tail = (t_pad != T)
    g = jnp.pad(g, ((0, t_pad - T), (0, b_pad - B), (0, 0)))

    # ---- explicit VMEM budget from the actual buffer sizes -----------------
    c_isz = jnp.dtype(compute_dtype).itemsize
    bytes_g = tb * bb * 2 * h_pad * c_isz
    bytes_out = tb * bb * h_pad * 4
    bytes_wh = h_pad * 2 * h_pad * c_isz
    bytes_h0 = bb * h_pad * 4
    bytes_scr = bb * h_pad * 4
    needed = 2 * (bytes_g + bytes_out + bytes_wh + bytes_h0) + bytes_scr
    # clamp to 64 MiB (v7x physical); v5e/v6e could go higher if ever required
    vmem_limit_bytes = int(min(max(int(needed * 1.25) + (1 << 20), 32 << 20),
                               64 << 20))

    grid_spec = pltpu.PrefetchScalarGridSpec(
        num_scalar_prefetch=0,
        grid=(b_pad // bb, t_pad // tb),                     # (batch, time)
        in_specs=[
            pl.BlockSpec((tb, bb, 2 * h_pad), lambda b, t: (t, b, 0)),  # g
            pl.BlockSpec((h_pad, 2 * h_pad), lambda b, t: (0, 0)),      # W_h
            pl.BlockSpec((bb, h_pad), lambda b, t: (b, 0)),             # h0
        ],
        out_specs=pl.BlockSpec((tb, bb, h_pad), lambda b, t: (t, b, 0)),
        scratch_shapes=[pltpu.VMEM((bb, h_pad), jnp.float32)],
    )

    kernel = functools.partial(
        gru_recurrence_kernel, tb=tb, h_pad=h_pad, seq_len=T,
        guard_tail=guard_tail)

    out = pl.pallas_call(
        kernel,
        out_shape=jax.ShapeDtypeStruct((t_pad, b_pad, h_pad), jnp.float32),
        grid_spec=grid_spec,
        compiler_params=pltpu.CompilerParams(
            # batch blocks are independent (megacore-shardable); the time
            # recurrence is serial.
            dimension_semantics=("parallel", "arbitrary"),
            vmem_limit_bytes=vmem_limit_bytes,
        ),
    )(g, w_h, h0)

    out = out[:T, :B, :H]
    return out, out[T - 1]


def init_params(key, input_size, hidden_size):
    """Deterministic uniform(-std, std) init, std = 1/sqrt(hidden_size).

    All 12 parameters of the PyTorch cell are created (including the unused
    reset-gate ones); the kernel only consumes the z / n parameters.
    """
    std = 1.0 / jnp.sqrt(jnp.float32(hidden_size))
    names_shapes = [
        ("W_ir", (input_size, hidden_size)), ("W_hr", (hidden_size, hidden_size)),
        ("b_ir", (1, hidden_size)),          ("b_hr", (1, hidden_size)),
        ("W_iz", (input_size, hidden_size)), ("W_hz", (hidden_size, hidden_size)),
        ("b_iz", (1, hidden_size)),          ("b_hz", (1, hidden_size)),
        ("W_in", (input_size, hidden_size)), ("W_hn", (hidden_size, hidden_size)),
        ("b_in", (1, hidden_size)),          ("b_hn", (1, hidden_size)),
    ]
    keys = jax.random.split(key, len(names_shapes))
    params = {}
    for (name, shape), k in zip(names_shapes, keys):
        params[name] = jax.random.uniform(
            k, shape, dtype=jnp.float32, minval=-std, maxval=std)
    return params


def custom_gru_reference(x, params, hx=None):
    """Pure-JAX reference (lax.scan) matching the PyTorch module semantics."""
    T, B, I = x.shape
    H = params["W_hz"].shape[0]
    if hx is None:
        hx = jnp.zeros((B, H), dtype=x.dtype)

    def step(h, xt):
        gr = xt @ params["W_ir"] + h @ params["W_hr"] + params["b_ir"] + params["b_hr"]
        gz = xt @ params["W_iz"] + h @ params["W_hz"] + params["b_iz"] + params["b_hz"]
        gn = xt @ params["W_in"] + h @ params["W_hn"] + params["b_in"] + params["b_hn"]
        _reset = jax.nn.sigmoid(gr)          # computed but unused, as in the module
        z = jax.nn.sigmoid(gz)
        n = jnp.tanh(gn)
        hy = (1.0 - z) * h + z * n
        return hy, hy

    h_last, out = jax.lax.scan(step, hx, x)
    return out, h_last


if __name__ == "__main__":
    # Small shapes consistent with the module: input_size=2, hidden_size=64,
    # seq-major input (T, B, I).
    I, H = 2, 64
    key = jax.random.PRNGKey(0)
    k_param, k_x1, k_x2 = jax.random.split(key, 3)
    params = init_params(k_param, I, H)

    # ---- test 1: default (bf16 MXU operands, large time_block) -------------
    T1, B1 = 8, 16
    x1 = jax.random.normal(k_x1, (T1, B1, I), dtype=jnp.float32)
    out1, h1 = custom_gru_forward(x1, params, time_block=32)
    out1 = jax.block_until_ready(out1)
    h1 = jax.block_until_ready(h1)
    ref1, href1 = custom_gru_reference(x1, params)
    assert out1.shape == (T1, B1, H) and h1.shape == (B1, H)
    assert jnp.allclose(out1, ref1, atol=1e-2, rtol=1e-2)
    assert jnp.allclose(h1, href1, atol=1e-2, rtol=1e-2)

    # ---- test 2: f32 path, padded time tail + 2 batch blocks ("parallel") --
    T2, B2 = 10, 16
    x2 = jax.random.normal(k_x2, (T2, B2, I), dtype=jnp.float32)
    out2, h2 = custom_gru_forward(x2, params, time_block=4, batch_block=8,
                                  compute_dtype=jnp.float32)
    out2 = jax.block_until_ready(out2)
    h2 = jax.block_until_ready(h2)
    ref2, href2 = custom_gru_reference(x2, params)
    assert out2.shape == (T2, B2, H) and h2.shape == (B2, H)
    assert jnp.allclose(out2, ref2, atol=1e-5, rtol=1e-5)
    assert jnp.allclose(h2, href2, atol=1e-5, rtol=1e-5)

    print("KERNEL_OK")
</pallas_src>

<mosaic_0001>
module attributes {stable_mosaic.version = 11 : i64} {
  func.func @gru_recurrence_kernel(%arg0: i32, %arg1: i32, %arg2: memref<8x16x256xbf16, #tpu.memory_space<vmem>>, %arg3: memref<128x256xbf16, #tpu.memory_space<vmem>>, %arg4: memref<16x128xf32, #tpu.memory_space<vmem>>, %arg5: memref<8x16x128xf32, #tpu.memory_space<vmem>>, %arg6: memref<16x128xf32, #tpu.memory_space<vmem>>) attributes {dimension_semantics = [#tpu.dimension_semantics<parallel>, #tpu.dimension_semantics<arbitrary>], iteration_bounds = array<i64: 1, 1>, scalar_prefetch = 0 : i64, scratch_operands = 1 : i64, tpu.core_type = #tpu.core_type<tc>, window_params = [{transform_indices = @transform_0, window_bounds = array<i64: 8, 16, 256>}, {pipeline_mode = #tpu.pipeline_mode<synchronous>, transform_indices = @transform_1, window_bounds = array<i64: 128, 256>}, {transform_indices = @transform_2, window_bounds = array<i64: 16, 128>}, {transform_indices = @transform_3, window_bounds = array<i64: 8, 16, 128>}]} {
    %c0_i32 = arith.constant 0 : i32
    %0 = arith.cmpi eq, %arg1, %c0_i32 : i32
    %1 = arith.extui %0 : i1 to i32
    %c0_i32_0 = arith.constant 0 : i32
    %2 = arith.cmpi ne, %1, %c0_i32_0 : i32
    scf.if %2 {
      %c0_54 = arith.constant 0 : index
      %c0_55 = arith.constant 0 : index
      %182 = vector.load %arg4[%c0_54, %c0_55] : memref<16x128xf32, #tpu.memory_space<vmem>>, vector<16x128xf32>
      %c0_56 = arith.constant 0 : index
      %c0_57 = arith.constant 0 : index
      %183 = vector.load %arg6[%c0_56, %c0_57] : memref<16x128xf32, #tpu.memory_space<vmem>>, vector<16x128xf32>
      tpu.vector_store %arg6[%c0_56, %c0_57], %182 {strides = array<i32>} : memref<16x128xf32, #tpu.memory_space<vmem>>, vector<16x128xf32>,
    } else {
    }
    %c0 = arith.constant 0 : index
    %c0_1 = arith.constant 0 : index
    %3 = vector.load %arg3[%c0, %c0_1] : memref<128x256xbf16, #tpu.memory_space<vmem>>, vector<128x256xbf16>
    %c0_2 = arith.constant 0 : index
    %c0_3 = arith.constant 0 : index
    %4 = vector.load %arg6[%c0_2, %c0_3] : memref<16x128xf32, #tpu.memory_space<vmem>>, vector<16x128xf32>
    %c0_i32_4 = arith.constant 0 : i32
    %5 = arith.index_cast %c0_i32_4 : i32 to index
    %c0_5 = arith.constant 0 : index
    %c0_6 = arith.constant 0 : index
    %6 = vector.load %arg2[%5, %c0_5, %c0_6] : memref<8x16x256xbf16, #tpu.memory_space<vmem>>, vector<1x16x256xbf16>
    %7 = vector.shape_cast %6 : vector<1x16x256xbf16> to vector<16x256xbf16>
    %8 = arith.extf %7 : vector<16x256xbf16> to vector<16x256xf32>
    %9 = arith.truncf %4 : vector<16x128xf32> to vector<16x128xbf16>
    %cst = arith.constant dense<0.000000e+00> : vector<16x256xf32>
    %10 = tpu.matmul %9, %3, %cst {dimension_numbers = #tpu.dot_dimension_numbers<[1], [0], [0], [1], [0, 0, 1, 1], [], []>} : vector<16x128xbf16>, vector<128x256xbf16>, vector<16x256xf32> -> vector<16x256xf32>
    %11 = arith.addf %8, %10 : vector<16x256xf32>
    %12 = vector.extract_strided_slice %11 {offsets = [0, 0], sizes = [16, 128], strides = [1, 1]} : vector<16x256xf32> to vector<16x128xf32>
    %13 = arith.negf %12 : vector<16x128xf32>
    %14 = math.exp %13 : vector<16x128xf32>
    %cst_7 = arith.constant 1.000000e+00 : f32
    %15 = vector.broadcast %cst_7 : f32 to vector<16x128xf32>
    %16 = arith.addf %15, %14 : vector<16x128xf32>
    %17 = arith.divf %15, %16 : vector<16x128xf32>
    %18 = vector.extract_strided_slice %11 {offsets = [0, 128], sizes = [16, 128], strides = [1, 1]} : vector<16x256xf32> to vector<16x128xf32>
    %19 = math.tanh %18 : vector<16x128xf32>
    %20 = arith.subf %19, %4 : vector<16x128xf32>
    %21 = arith.mulf %17, %20 : vector<16x128xf32>
    %22 = arith.addf %4, %21 : vector<16x128xf32>
    %23 = arith.index_cast %c0_i32_4 : i32 to index
    %c0_8 = arith.constant 0 : index
    %c0_9 = arith.constant 0 : index
    %24 = vector.load %arg5[%23, %c0_8, %c0_9] : memref<8x16x128xf32, #tpu.memory_space<vmem>>, vector<1x16x128xf32>
    %25 = vector.shape_cast %24 : vector<1x16x128xf32> to vector<16x128xf32>
    %26 = vector.shape_cast %22 : vector<16x128xf32> to vector<1x16x128xf32>
    tpu.vector_store %arg5[%23, %c0_8, %c0_9], %26 {strides = array<i32>} : memref<8x16x128xf32, #tpu.memory_space<vmem>>, vector<1x16x128xf32>,
    %c1_i32 = arith.constant 1 : i32
    %27 = arith.index_cast %c1_i32 : i32 to index
    %c0_10 = arith.constant 0 : index
    %c0_11 = arith.constant 0 : index
    %28 = vector.load %arg2[%27, %c0_10, %c0_11] : memref<8x16x256xbf16, #tpu.memory_space<vmem>>, vector<1x16x256xbf16>
    %29 = vector.shape_cast %28 : vector<1x16x256xbf16> to vector<16x256xbf16>
    %30 = arith.extf %29 : vector<16x256xbf16> to vector<16x256xf32>
    %31 = arith.truncf %22 : vector<16x128xf32> to vector<16x128xbf16>
    %cst_12 = arith.constant dense<0.000000e+00> : vector<16x256xf32>
    %32 = tpu.matmul %31, %3, %cst_12 {dimension_numbers = #tpu.dot_dimension_numbers<[1], [0], [0], [1], [0, 0, 1, 1], [], []>} : vector<16x128xbf16>, vector<128x256xbf16>, vector<16x256xf32> -> vector<16x256xf32>
    %33 = arith.addf %30, %32 : vector<16x256xf32>
    %34 = vector.extract_strided_slice %33 {offsets = [0, 0], sizes = [16, 128], strides = [1, 1]} : vector<16x256xf32> to vector<16x128xf32>
    %35 = arith.negf %34 : vector<16x128xf32>
    %36 = math.exp %35 : vector<16x128xf32>
    %cst_13 = arith.constant 1.000000e+00 : f32
    %37 = vector.broadcast %cst_13 : f32 to vector<16x128xf32>
    %38 = arith.addf %37, %36 : vector<16x128xf32>
    %39 = arith.divf %37, %38 : vector<16x128xf32>
    %40 = vector.extract_strided_slice %33 {offsets = [0, 128], sizes = [16, 128], strides = [1, 1]} : vector<16x256xf32> to vector<16x128xf32>
    %41 = math.tanh %40 : vector<16x128xf32>
    %42 = arith.subf %41, %22 : vector<16x128xf32>
    %43 = arith.mulf %39, %42 : vector<16x128xf32>
    %44 = arith.addf %22, %43 : vector<16x128xf32>
    %45 = arith.index_cast %c1_i32 : i32 to index
    %c0_14 = arith.constant 0 : index
    %c0_15 = arith.constant 0 : index
    %46 = vector.load %arg5[%45, %c0_14, %c0_15] : memref<8x16x128xf32, #tpu.memory_space<vmem>>, vector<1x16x128xf32>
    %47 = vector.shape_cast %46 : vector<1x16x128xf32> to vector<16x128xf32>
    %48 = vector.shape_cast %44 : vector<16x128xf32> to vector<1x16x128xf32>
    tpu.vector_store %arg5[%45, %c0_14, %c0_15], %48 {strides = array<i32>} : memref<8x16x128xf32, #tpu.memory_space<vmem>>, vector<1x16x128xf32>,
    %c2_i32 = arith.constant 2 : i32
    %49 = arith.index_cast %c2_i32 : i32 to index
    %c0_16 = arith.constant 0 : index
    %c0_17 = arith.constant 0 : index
    %50 = vector.load %arg2[%49, %c0_16, %c0_17] : memref<8x16x256xbf16, #tpu.memory_space<vmem>>, vector<1x16x256xbf16>
    %51 = vector.shape_cast %50 : vector<1x16x256xbf16> to vector<16x256xbf16>
    %52 = arith.extf %51 : vector<16x256xbf16> to vector<16x256xf32>
    %53 = arith.truncf %44 : vector<16x128xf32> to vector<16x128xbf16>
    %cst_18 = arith.constant dense<0.000000e+00> : vector<16x256xf32>
    %54 = tpu.matmul %53, %3, %cst_18 {dimension_numbers = #tpu.dot_dimension_numbers<[1], [0], [0], [1], [0, 0, 1, 1], [], []>} : vector<16x128xbf16>, vector<128x256xbf16>, vector<16x256xf32> -> vector<16x256xf32>
    %55 = arith.addf %52, %54 : vector<16x256xf32>
    %56 = vector.extract_strided_slice %55 {offsets = [0, 0], sizes = [16, 128], strides = [1, 1]} : vector<16x256xf32> to vector<16x128xf32>
    %57 = arith.negf %56 : vector<16x128xf32>
    %58 = math.exp %57 : vector<16x128xf32>
    %cst_19 = arith.constant 1.000000e+00 : f32
    %59 = vector.broadcast %cst_19 : f32 to vector<16x128xf32>
    %60 = arith.addf %59, %58 : vector<16x128xf32>
    %61 = arith.divf %59, %60 : vector<16x128xf32>
    %62 = vector.extract_strided_slice %55 {offsets = [0, 128], sizes = [16, 128], strides = [1, 1]} : vector<16x256xf32> to vector<16x128xf32>
    %63 = math.tanh %62 : vector<16x128xf32>
    %64 = arith.subf %63, %44 : vector<16x128xf32>
    %65 = arith.mulf %61, %64 : vector<16x128xf32>
    %66 = arith.addf %44, %65 : vector<16x128xf32>
    %67 = arith.index_cast %c2_i32 : i32 to index
    %c0_20 = arith.constant 0 : index
    %c0_21 = arith.constant 0 : index
    %68 = vector.load %arg5[%67, %c0_20, %c0_21] : memref<8x16x128xf32, #tpu.memory_space<vmem>>, vector<1x16x128xf32>
    %69 = vector.shape_cast %68 : vector<1x16x128xf32> to vector<16x128xf32>
    %70 = vector.shape_cast %66 : vector<16x128xf32> to vector<1x16x128xf32>
    tpu.vector_store %arg5[%67, %c0_20, %c0_21], %70 {strides = array<i32>} : memref<8x16x128xf32, #tpu.memory_space<vmem>>, vector<1x16x128xf32>,
    %c3_i32 = arith.constant 3 : i32
    %71 = arith.index_cast %c3_i32 : i32 to index
    %c0_22 = arith.constant 0 : index
    %c0_23 = arith.constant 0 : index
    %72 = vector.load %arg2[%71, %c0_22, %c0_23] : memref<8x16x256xbf16, #tpu.memory_space<vmem>>, vector<1x16x256xbf16>
    %73 = vector.shape_cast %72 : vector<1x16x256xbf16> to vector<16x256xbf16>
    %74 = arith.extf %73 : vector<16x256xbf16> to vector<16x256xf32>
    %75 = arith.truncf %66 : vector<16x128xf32> to vector<16x128xbf16>
    %cst_24 = arith.constant dense<0.000000e+00> : vector<16x256xf32>
    %76 = tpu.matmul %75, %3, %cst_24 {dimension_numbers = #tpu.dot_dimension_numbers<[1], [0], [0], [1], [0, 0, 1, 1], [], []>} : vector<16x128xbf16>, vector<128x256xbf16>, vector<16x256xf32> -> vector<16x256xf32>
    %77 = arith.addf %74, %76 : vector<16x256xf32>
    %78 = vector.extract_strided_slice %77 {offsets = [0, 0], sizes = [16, 128], strides = [1, 1]} : vector<16x256xf32> to vector<16x128xf32>
    %79 = arith.negf %78 : vector<16x128xf32>
    %80 = math.exp %79 : vector<16x128xf32>
    %cst_25 = arith.constant 1.000000e+00 : f32
    %81 = vector.broadcast %cst_25 : f32 to vector<16x128xf32>
    %82 = arith.addf %81, %80 : vector<16x128xf32>
    %83 = arith.divf %81, %82 : vector<16x128xf32>
    %84 = vector.extract_strided_slice %77 {offsets = [0, 128], sizes = [16, 128], strides = [1, 1]} : vector<16x256xf32> to vector<16x128xf32>
    %85 = math.tanh %84 : vector<16x128xf32>
    %86 = arith.subf %85, %66 : vector<16x128xf32>
    %87 = arith.mulf %83, %86 : vector<16x128xf32>
    %88 = arith.addf %66, %87 : vector<16x128xf32>
    %89 = arith.index_cast %c3_i32 : i32 to index
    %c0_26 = arith.constant 0 : index
    %c0_27 = arith.constant 0 : index
    %90 = vector.load %arg5[%89, %c0_26, %c0_27] : memref<8x16x128xf32, #tpu.memory_space<vmem>>, vector<1x16x128xf32>
    %91 = vector.shape_cast %90 : vector<1x16x128xf32> to vector<16x128xf32>
    %92 = vector.shape_cast %88 : vector<16x128xf32> to vector<1x16x128xf32>
    tpu.vector_store %arg5[%89, %c0_26, %c0_27], %92 {strides = array<i32>} : memref<8x16x128xf32, #tpu.memory_space<vmem>>, vector<1x16x128xf32>,
    %c4_i32 = arith.constant 4 : i32
    %93 = arith.index_cast %c4_i32 : i32 to index
    %c0_28 = arith.constant 0 : index
    %c0_29 = arith.constant 0 : index
    %94 = vector.load %arg2[%93, %c0_28, %c0_29] : memref<8x16x256xbf16, #tpu.memory_space<vmem>>, vector<1x16x256xbf16>
    %95 = vector.shape_cast %94 : vector<1x16x256xbf16> to vector<16x256xbf16>
    %96 = arith.extf %95 : vector<16x256xbf16> to vector<16x256xf32>
    %97 = arith.truncf %88 : vector<16x128xf32> to vector<16x128xbf16>
    %cst_30 = arith.constant dense<0.000000e+00> : vector<16x256xf32>
    %98 = tpu.matmul %97, %3, %cst_30 {dimension_numbers = #tpu.dot_dimension_numbers<[1], [0], [0], [1], [0, 0, 1, 1], [], []>} : vector<16x128xbf16>, vector<128x256xbf16>, vector<16x256xf32> -> vector<16x256xf32>
    %99 = arith.addf %96, %98 : vector<16x256xf32>
    %100 = vector.extract_strided_slice %99 {offsets = [0, 0], sizes = [16, 128], strides = [1, 1]} : vector<16x256xf32> to vector<16x128xf32>
    %101 = arith.negf %100 : vector<16x128xf32>
    %102 = math.exp %101 : vector<16x128xf32>
    %cst_31 = arith.constant 1.000000e+00 : f32
    %103 = vector.broadcast %cst_31 : f32 to vector<16x128xf32>
    %104 = arith.addf %103, %102 : vector<16x128xf32>
    %105 = arith.divf %103, %104 : vector<16x128xf32>
    %106 = vector.extract_strided_slice %99 {offsets = [0, 128], sizes = [16, 128], strides = [1, 1]} : vector<16x256xf32> to vector<16x128xf32>
    %107 = math.tanh %106 : vector<16x128xf32>
    %108 = arith.subf %107, %88 : vector<16x128xf32>
    %109 = arith.mulf %105, %108 : vector<16x128xf32>
    %110 = arith.addf %88, %109 : vector<16x128xf32>
    %111 = arith.index_cast %c4_i32 : i32 to index
    %c0_32 = arith.constant 0 : index
    %c0_33 = arith.constant 0 : index
    %112 = vector.load %arg5[%111, %c0_32, %c0_33] : memref<8x16x128xf32, #tpu.memory_space<vmem>>, vector<1x16x128xf32>
    %113 = vector.shape_cast %112 : vector<1x16x128xf32> to vector<16x128xf32>
    %114 = vector.shape_cast %110 : vector<16x128xf32> to vector<1x16x128xf32>
    tpu.vector_store %arg5[%111, %c0_32, %c0_33], %114 {strides = array<i32>} : memref<8x16x128xf32, #tpu.memory_space<vmem>>, vector<1x16x128xf32>,
    %c5_i32 = arith.constant 5 : i32
    %115 = arith.index_cast %c5_i32 : i32 to index
    %c0_34 = arith.constant 0 : index
    %c0_35 = arith.constant 0 : index
    %116 = vector.load %arg2[%115, %c0_34, %c0_35] : memref<8x16x256xbf16, #tpu.memory_space<vmem>>, vector<1x16x256xbf16>
    %117 = vector.shape_cast %116 : vector<1x16x256xbf16> to vector<16x256xbf16>
    %118 = arith.extf %117 : vector<16x256xbf16> to vector<16x256xf32>
    %119 = arith.truncf %110 : vector<16x128xf32> to vector<16x128xbf16>
    %cst_36 = arith.constant dense<0.000000e+00> : vector<16x256xf32>
    %120 = tpu.matmul %119, %3, %cst_36 {dimension_numbers = #tpu.dot_dimension_numbers<[1], [0], [0], [1], [0, 0, 1, 1], [], []>} : vector<16x128xbf16>, vector<128x256xbf16>, vector<16x256xf32> -> vector<16x256xf32>
    %121 = arith.addf %118, %120 : vector<16x256xf32>
    %122 = vector.extract_strided_slice %121 {offsets = [0, 0], sizes = [16, 128], strides = [1, 1]} : vector<16x256xf32> to vector<16x128xf32>
    %123 = arith.negf %122 : vector<16x128xf32>
    %124 = math.exp %123 : vector<16x128xf32>
    %cst_37 = arith.constant 1.000000e+00 : f32
    %125 = vector.broadcast %cst_37 : f32 to vector<16x128xf32>
    %126 = arith.addf %125, %124 : vector<16x128xf32>
    %127 = arith.divf %125, %126 : vector<16x128xf32>
    %128 = vector.extract_strided_slice %121 {offsets = [0, 128], sizes = [16, 128], strides = [1, 1]} : vector<16x256xf32> to vector<16x128xf32>
    %129 = math.tanh %128 : vector<16x128xf32>
    %130 = arith.subf %129, %110 : vector<16x128xf32>
    %131 = arith.mulf %127, %130 : vector<16x128xf32>
    %132 = arith.addf %110, %131 : vector<16x128xf32>
    %133 = arith.index_cast %c5_i32 : i32 to index
    %c0_38 = arith.constant 0 : index
    %c0_39 = arith.constant 0 : index
    %134 = vector.load %arg5[%133, %c0_38, %c0_39] : memref<8x16x128xf32, #tpu.memory_space<vmem>>, vector<1x16x128xf32>
    %135 = vector.shape_cast %134 : vector<1x16x128xf32> to vector<16x128xf32>
    %136 = vector.shape_cast %132 : vector<16x128xf32> to vector<1x16x128xf32>
    tpu.vector_store %arg5[%133, %c0_38, %c0_39], %136 {strides = array<i32>} : memref<8x16x128xf32, #tpu.memory_space<vmem>>, vector<1x16x128xf32>,
    %c6_i32 = arith.constant 6 : i32
    %137 = arith.index_cast %c6_i32 : i32 to index
    %c0_40 = arith.constant 0 : index
    %c0_41 = arith.constant 0 : index
    %138 = vector.load %arg2[%137, %c0_40, %c0_41] : memref<8x16x256xbf16, #tpu.memory_space<vmem>>, vector<1x16x256xbf16>
    %139 = vector.shape_cast %138 : vector<1x16x256xbf16> to vector<16x256xbf16>
    %140 = arith.extf %139 : vector<16x256xbf16> to vector<16x256xf32>
    %141 = arith.truncf %132 : vector<16x128xf32> to vector<16x128xbf16>
    %cst_42 = arith.constant dense<0.000000e+00> : vector<16x256xf32>
    %142 = tpu.matmul %141, %3, %cst_42 {dimension_numbers = #tpu.dot_dimension_numbers<[1], [0], [0], [1], [0, 0, 1, 1], [], []>} : vector<16x128xbf16>, vector<128x256xbf16>, vector<16x256xf32> -> vector<16x256xf32>
    %143 = arith.addf %140, %142 : vector<16x256xf32>
    %144 = vector.extract_strided_slice %143 {offsets = [0, 0], sizes = [16, 128], strides = [1, 1]} : vector<16x256xf32> to vector<16x128xf32>
    %145 = arith.negf %144 : vector<16x128xf32>
    %146 = math.exp %145 : vector<16x128xf32>
    %cst_43 = arith.constant 1.000000e+00 : f32
    %147 = vector.broadcast %cst_43 : f32 to vector<16x128xf32>
    %148 = arith.addf %147, %146 : vector<16x128xf32>
    %149 = arith.divf %147, %148 : vector<16x128xf32>
    %150 = vector.extract_strided_slice %143 {offsets = [0, 128], sizes = [16, 128], strides = [1, 1]} : vector<16x256xf32> to vector<16x128xf32>
    %151 = math.tanh %150 : vector<16x128xf32>
    %152 = arith.subf %151, %132 : vector<16x128xf32>
    %153 = arith.mulf %149, %152 : vector<16x128xf32>
    %154 = arith.addf %132, %153 : vector<16x128xf32>
    %155 = arith.index_cast %c6_i32 : i32 to index
    %c0_44 = arith.constant 0 : index
    %c0_45 = arith.constant 0 : index
    %156 = vector.load %arg5[%155, %c0_44, %c0_45] : memref<8x16x128xf32, #tpu.memory_space<vmem>>, vector<1x16x128xf32>
    %157 = vector.shape_cast %156 : vector<1x16x128xf32> to vector<16x128xf32>
    %158 = vector.shape_cast %154 : vector<16x128xf32> to vector<1x16x128xf32>
    tpu.vector_store %arg5[%155, %c0_44, %c0_45], %158 {strides = array<i32>} : memref<8x16x128xf32, #tpu.memory_space<vmem>>, vector<1x16x128xf32>,
    %c7_i32 = arith.constant 7 : i32
    %159 = arith.index_cast %c7_i32 : i32 to index
    %c0_46 = arith.constant 0 : index
    %c0_47 = arith.constant 0 : index
    %160 = vector.load %arg2[%159, %c0_46, %c0_47] : memref<8x16x256xbf16, #tpu.memory_space<vmem>>, vector<1x16x256xbf16>
    %161 = vector.shape_cast %160 : vector<1x16x256xbf16> to vector<16x256xbf16>
    %162 = arith.extf %161 : vector<16x256xbf16> to vector<16x256xf32>
    %163 = arith.truncf %154 : vector<16x128xf32> to vector<16x128xbf16>
    %cst_48 = arith.constant dense<0.000000e+00> : vector<16x256xf32>
    %164 = tpu.matmul %163, %3, %cst_48 {dimension_numbers = #tpu.dot_dimension_numbers<[1], [0], [0], [1], [0, 0, 1, 1], [], []>} : vector<16x128xbf16>, vector<128x256xbf16>, vector<16x256xf32> -> vector<16x256xf32>
    %165 = arith.addf %162, %164 : vector<16x256xf32>
    %166 = vector.extract_strided_slice %165 {offsets = [0, 0], sizes = [16, 128], strides = [1, 1]} : vector<16x256xf32> to vector<16x128xf32>
    %167 = arith.negf %166 : vector<16x128xf32>
    %168 = math.exp %167 : vector<16x128xf32>
    %cst_49 = arith.constant 1.000000e+00 : f32
    %169 = vector.broadcast %cst_49 : f32 to vector<16x128xf32>
    %170 = arith.addf %169, %168 : vector<16x128xf32>
    %171 = arith.divf %169, %170 : vector<16x128xf32>
    %172 = vector.extract_strided_slice %165 {offsets = [0, 128], sizes = [16, 128], strides = [1, 1]} : vector<16x256xf32> to vector<16x128xf32>
    %173 = math.tanh %172 : vector<16x128xf32>
    %174 = arith.subf %173, %154 : vector<16x128xf32>
    %175 = arith.mulf %171, %174 : vector<16x128xf32>
    %176 = arith.addf %154, %175 : vector<16x128xf32>
    %177 = arith.index_cast %c7_i32 : i32 to index
    %c0_50 = arith.constant 0 : index
    %c0_51 = arith.constant 0 : index
    %178 = vector.load %arg5[%177, %c0_50, %c0_51] : memref<8x16x128xf32, #tpu.memory_space<vmem>>, vector<1x16x128xf32>
    %179 = vector.shape_cast %178 : vector<1x16x128xf32> to vector<16x128xf32>
    %180 = vector.shape_cast %176 : vector<16x128xf32> to vector<1x16x128xf32>
    tpu.vector_store %arg5[%177, %c0_50, %c0_51], %180 {strides = array<i32>} : memref<8x16x128xf32, #tpu.memory_space<vmem>>, vector<1x16x128xf32>,
    %c8_i32 = arith.constant 8 : i32
    %c0_52 = arith.constant 0 : index
    %c0_53 = arith.constant 0 : index
    %181 = vector.load %arg6[%c0_52, %c0_53] : memref<16x128xf32, #tpu.memory_space<vmem>>, vector<16x128xf32>
    tpu.vector_store %arg6[%c0_52, %c0_53], %176 {strides = array<i32>} : memref<16x128xf32, #tpu.memory_space<vmem>>, vector<16x128xf32>,
    return
  }
  func.func @transform_0(%arg0: i32, %arg1: i32) -> (i32, i32, i32) {
    %c0_i32 = arith.constant 0 : i32
    %c0_i32_0 = arith.constant 0 : i32
    return %arg1, %arg0, %c0_i32 : i32, i32, i32
  }
  func.func @transform_1(%arg0: i32, %arg1: i32) -> (i32, i32) {
    %c0_i32 = arith.constant 0 : i32
    %c0_i32_0 = arith.constant 0 : i32
    %c0_i32_1 = arith.constant 0 : i32
    return %c0_i32, %c0_i32_0 : i32, i32
  }
  func.func @transform_2(%arg0: i32, %arg1: i32) -> (i32, i32) {
    %c0_i32 = arith.constant 0 : i32
    %c0_i32_0 = arith.constant 0 : i32
    return %arg0, %c0_i32 : i32, i32
  }
  func.func @transform_3(%arg0: i32, %arg1: i32) -> (i32, i32, i32) {
    %c0_i32 = arith.constant 0 : i32
    %c0_i32_0 = arith.constant 0 : i32
    return %arg1, %arg0, %c0_i32 : i32, i32, i32
  }
}

</mosaic_0001>

<bundles_post_ra>
// kernel: tpu_custom_call.1
= control target key start
LH: loop header
LB: loop body
LE: loop exit
PB: predicated region body
PF: predicated region fallthrough
CT: control target
= control target key end

     0   :  { %8 = vsyncpa [#allocation4], 0  ;;  %s1320_s0 = inlined_call_operand.hbm [shape: bf16[8,16,256], index: 0, kind: input, shape index: {}]   ;;  %s1321_s1 = inlined_call_operand.hbm [shape: bf16[128,256], index: 1, kind: input, shape index: {}]   ;;  %s1322_s2 = inlined_call_operand.hbm [shape: f32[16,128], index: 2, kind: input, shape index: {}]   ;;  %s1323_s3 = inlined_call_operand.hbm [shape: f32[8,16,128], index: 3, kind: output, shape index: {}]  }
   0x1   :  { %9 = vsyncpa [#allocation7], 0 }
   0x2   :  { %10 = vsyncpa [#allocation5], 0  ;;  %s1058_s12 = smov [#allocation6]   ;;  %s1059_s14 = smov [#allocation3]  }
   0x3   :  { %s28_s13 = sshll.u32 %s1058_s12, 4  ;;  %s16_s15 = sshll.u32 %s1059_s14, 4  ;;  %s29_s13 = int_to_ptr.vmem [resolvable:$true] %s28_s13  ;;  %s1085_s15 = int_to_ptr.vmem [resolvable:$true] %s16_s15 }
   0x4   :  { %s964_s18 = scalar_lea.hbm %s1321_s1, 2048 }
   0x5   :  { %p965_p0 = scmp.ne.s32.totalorder %s1321_s1, %s964_s18  ;;  %p968_p1 = scmp.lt.u32.totalorder %s964_s18, %s1321_s1 }
   0x7   :  { %p970_p2 = pnand %p968_p1, %p965_p0 }
   0x9   :  { %973 = shalt.err (!%p970_p2)
}
   0xa   :  { %s974_s23 = scalar_lea.vmem %s29_s13, 2048  ;;  %p979_p4 = scmp.lt.s32.totalorder %s29_s13, %s29_s13 }
   0xb   :  { %p975_p3 = scmp.ne.s32.totalorder %s29_s13, %s974_s23  ;;  %p980_p5 = scmp.lt.s32.totalorder %s974_s23, %s974_s23 }
   0xd   :  { %p981_p6 = por %p980_p5, %p979_p4 }
   0xf   :  { %p982_p7 = pnand %p981_p6, %p975_p3 }
  0x11   :  { %985 = shalt.err (!%p982_p7)
}
  0x12   :  { %s1060_s24 = smov 128   ;;  %s1061_s25 = smov 8  }
  0x13   :  { %34 = dma.hbm_to_vmem [thread:$0]  %s1321_s1, 2048, %s29_s13, [#allocation7], %s1060_s24, %s1060_s24, %s1061_s25  }
  0x14   :  { %s986_s30 = scalar_lea.hbm %s1320_s0, 2048 }
  0x15   :  { %p987_p8 = scmp.ne.s32.totalorder %s1320_s0, %s986_s30  ;;  %p990_p9 = scmp.lt.u32.totalorder %s986_s30, %s1320_s0 }
  0x17   :  { %p992_p10 = pnand %p990_p9, %p987_p8 }
  0x19   :  { %995 = shalt.err (!%p992_p10)
}
  0x1a   :  { %s996_s8 = scalar_lea.vmem %s1085_s15, 2048  ;;  %p1001_p12 = scmp.lt.s32.totalorder %s1085_s15, %s1085_s15 }
  0x1b   :  { %p997_p11 = scmp.ne.s32.totalorder %s1085_s15, %s996_s8  ;;  %p1002_p13 = scmp.lt.s32.totalorder %s996_s8, %s996_s8 }
  0x1d   :  { %p1003_p0 = por %p1002_p13, %p1001_p12 }
  0x1f   :  { %p1004_p1 = pnand %p1003_p0, %p997_p11 }
  0x21   :  { %1007 = shalt.err (!%p1004_p1)
}
  0x22   :  { %22 = dma.hbm_to_vmem [thread:$0]  %s1320_s0, 2048, %s1085_s15, [#allocation4], %s1060_s24, %s1060_s24, %s1061_s25  }
  0x23   :  { %s1062_s10 = smov [#allocation8]   ;;  %s1008_s14 = scalar_lea.hbm %s1322_s2, 256 }
  0x24   :  { %s40_s11 = sshll.u32 %s1062_s10, 4  ;;  %p1009_p2 = scmp.ne.s32.totalorder %s1322_s2, %s1008_s14  ;;  %s41_s11 = int_to_ptr.vmem [resolvable:$true] %s40_s11 }
  0x25   :  { %p1012_p3 = scmp.lt.u32.totalorder %s1008_s14, %s1322_s2 }
  0x27   :  { %p1014_p4 = pnand %p1012_p3, %p1009_p2 }
  0x29   :  { %1017 = shalt.err (!%p1014_p4)
}
  0x2a   :  { %s1018_s20 = scalar_lea.vmem %s41_s11, 256  ;;  %p1023_p6 = scmp.lt.s32.totalorder %s41_s11, %s41_s11 }
  0x2b   :  { %p1019_p5 = scmp.ne.s32.totalorder %s41_s11, %s1018_s20  ;;  %p1024_p7 = scmp.lt.s32.totalorder %s1018_s20, %s1018_s20 }
  0x2d   :  { %p1025_p8 = por %p1024_p7, %p1023_p6 }
  0x2f   :  { %p1026_p9 = pnand %p1025_p8, %p1019_p5 }
  0x31   :  { %1029 = shalt.err (!%p1026_p9)
}
  0x32   :  { %46 = dma.hbm_to_vmem [thread:$0]  %s1322_s2, 256, %s41_s11, [#allocation7], %s1060_s24, %s1060_s24, %s1061_s25  }
  0x33   :  { %1052 = dma.done.wait [#allocation4], 2048  }
  0x34   :  { %1053 = vsyncadd [#allocation4], 4294965248 }
  0x35   :  { %1054 = dma.done.wait [#allocation7], 2304  }
  0x36   :  { %1055 = vsyncadd [#allocation7], 4294964992  ;;  %v1063_v0 = vmov 0   ;;  %v1139_v1 = vld [vmem:[#allocation6 + $0x4] ss:$8 sps:$4 sm:$0xff]   ;;  %v240_v51 = vld [vmem:[#allocation3 + $0x10] sm:$0xff] }
  0x37   :  { %202 = vmatprep.mubr.bf16.mxu0 %v1063_v0  ;;  %279 = vmatprep.mubr.bf16.mxu1 %v1063_v0  ;;  %v1141_v2 = vld [vmem:[#allocation6] ss:$8 sps:$4 sm:$0xff]   ;;  %v1144_v3 = vld [vmem:[#allocation6 + $0x14] ss:$8 sps:$4 sm:$0xff]   ;;  %v1148_v4 = vld [vmem:[#allocation6 + $0x10] ss:$8 sps:$4 sm:$0xff]   ;;  %v242_v53 = vunpack.c.l.bf16 %v240_v51  ;;  %v243_v63 = vunpack.c.h.bf16 %v240_v51 }
  0x38   :  { %170 = vmatprep.subr.bf16.mxu0 %v1139_v1  ;;  %247 = vmatprep.subr.bf16.mxu1 %v1139_v1  ;;  %v1152_v5 = vld [vmem:[#allocation6 + $0x24] ss:$8 sps:$4 sm:$0xff]   ;;  %v1156_v6 = vld [vmem:[#allocation6 + $0x20] ss:$8 sps:$4 sm:$0xff]   ;;  %v1160_v7 = vld [vmem:[#allocation6 + $0x34] ss:$8 sps:$4 sm:$0xff]  }
  0x39   :  { %171 = vmatpush1.bf16.msra.mxu0 %v1141_v2  ;;  %248 = vmatpush1.bf16.msra.mxu1 %v1141_v2  ;;  %v1164_v8 = vld [vmem:[#allocation6 + $0x30] ss:$8 sps:$4 sm:$0xff]   ;;  %v1168_v9 = vld [vmem:[#allocation6 + $0x44] ss:$8 sps:$4 sm:$0xff]   ;;  %v1172_v10 = vld [vmem:[#allocation6 + $0x40] ss:$8 sps:$4 sm:$0xff]  }
  0x3a   :  { %172 = vmatprep.subr.bf16.mxu0 %v1144_v3  ;;  %249 = vmatprep.subr.bf16.mxu1 %v1144_v3  ;;  %v1176_v11 = vld [vmem:[#allocation6 + $0x54] ss:$8 sps:$4 sm:$0xff]   ;;  %v1180_v12 = vld [vmem:[#allocation6 + $0x50] ss:$8 sps:$4 sm:$0xff]   ;;  %v1184_v13 = vld [vmem:[#allocation6 + $0x64] ss:$8 sps:$4 sm:$0xff]  }
  0x3b   :  { %v1188_v14 = vld [vmem:[#allocation6 + $0x60] ss:$8 sps:$4 sm:$0xff]   ;;  %v1192_v15 = vld [vmem:[#allocation6 + $0x74] ss:$8 sps:$4 sm:$0xff]   ;;  %v1196_v16 = vld [vmem:[#allocation6 + $0x70] ss:$8 sps:$4 sm:$0xff]  }
  0x3c   :  { %v61_v17 = vld [vmem:[#allocation8] sm:$0xff]  ;;  %v62_v18 = vld [vmem:[#allocation8 + $0x8] sm:$0xff]  ;;  %v241_v52 = vld [vmem:[#allocation3 + $0x18] sm:$0xff]  ;;  %s1064_s2 = smov [#allocation9]  }
  0x3d   :  { %173 = vmatpush1.bf16.msra.mxu0 %v1148_v4  ;;  %250 = vmatpush1.bf16.msra.mxu1 %v1148_v4  ;;  %v89_v19 = vpack.c.bf16 %v62_v18, %v61_v17  ;;  %v83_v20 = vld [vmem:[#allocation3] sm:$0xff]  ;;  %v84_v21 = vld [vmem:[#allocation3 + $0x8] sm:$0xff]  ;;  %v244_v54 = vunpack.c.l.bf16 %v241_v52  ;;  %s792_s21 = sshll.u32 %s1064_s2, 4  ;;  %s793_s21 = int_to_ptr.vmem [resolvable:$true] %s792_s21 }
  0x3e   :  { %174 = vmatprep.subr.bf16.mxu0 %v1152_v5  ;;  %251 = vmatprep.subr.bf16.mxu1 %v1152_v5  ;;  %v85_v22 = vunpack.c.l.bf16 %v83_v20  ;;  %v87_v23 = vunpack.c.l.bf16 %v84_v21  ;;  %v86_v32 = vunpack.c.h.bf16 %v83_v20  ;;  %v88_v33 = vunpack.c.h.bf16 %v84_v21  ;;  %s1030_s22 = scalar_lea.vmem %s793_s21, 2048  ;;  %p1035_p11 = scmp.lt.s32.totalorder %s793_s21, %s793_s21 }
  0x3f   :  { %p1031_p10 = scmp.ne.s32.totalorder %s793_s21, %s1030_s22  ;;  %p1036_p12 = scmp.lt.s32.totalorder %s1030_s22, %s1030_s22 }
  0x41   :  { %175 = vmatpush1.bf16.msra.mxu0 %v1156_v6  ;;  %252 = vmatpush1.bf16.msra.mxu1 %v1156_v6  ;;  %p1037_p13 = por %p1036_p12, %p1035_p11 }
  0x42   :  { %176 = vmatprep.subr.bf16.mxu0 %v1160_v7  ;;  %253 = vmatprep.subr.bf16.mxu1 %v1160_v7 }
  0x43   :  { %p1038_p0 = pnand %p1037_p13, %p1031_p10 }
  0x45   :  { %177 = vmatpush1.bf16.msra.mxu0 %v1164_v8  ;;  %254 = vmatpush1.bf16.msra.mxu1 %v1164_v8 }
  0x46   :  { %178 = vmatprep.subr.bf16.mxu0 %v1168_v9  ;;  %255 = vmatprep.subr.bf16.mxu1 %v1168_v9 }
  0x49   :  { %179 = vmatpush1.bf16.msra.mxu0 %v1172_v10  ;;  %256 = vmatpush1.bf16.msra.mxu1 %v1172_v10 }
  0x4a   :  { %180 = vmatprep.subr.bf16.mxu0 %v1176_v11  ;;  %257 = vmatprep.subr.bf16.mxu1 %v1176_v11 }
  0x4d   :  { %181 = vmatpush1.bf16.msra.mxu0 %v1180_v12  ;;  %258 = vmatpush1.bf16.msra.mxu1 %v1180_v12 }
  0x4e   :  { %182 = vmatprep.subr.bf16.mxu0 %v1184_v13  ;;  %259 = vmatprep.subr.bf16.mxu1 %v1184_v13 }
  0x51   :  { %183 = vmatpush1.bf16.msra.mxu0 %v1188_v14  ;;  %260 = vmatpush1.bf16.msra.mxu1 %v1188_v14 }
  0x52   :  { %184 = vmatprep.subr.bf16.mxu0 %v1192_v15  ;;  %261 = vmatprep.subr.bf16.mxu1 %v1192_v15 }
  0x55   :  { %185 = vmatpush1.bf16.msra.mxu0 %v1196_v16  ;;  %262 = vmatpush1.bf16.msra.mxu1 %v1196_v16 }
  0x56   :  { %325 = vmatprep.subr.bf16.mxu0 %v1139_v1  ;;  %403 = vmatprep.subr.bf16.mxu1 %v1139_v1 }
  0x58   :  { %203 = vmatmul.mubr.bf16.vlgmr.msra.gmra.mrb[0].mxu0 %v89_v19 }
  0x59   :  { %326 = vmatpush1.bf16.msra.mxu0 %v1141_v2  ;;  %357 = vmatprep.mubr.bf16.mxu0 %v1063_v0 }
  0x5a   :  { %327 = vmatprep.subr.bf16.mxu0 %v1144_v3 }
  0x5d   :  { %328 = vmatpush1.bf16.msra.mxu0 %v1148_v4 }
  0x5e   :  { %329 = vmatprep.subr.bf16.mxu0 %v1152_v5 }
  0x61   :  { %330 = vmatpush1.bf16.msra.mxu0 %v1156_v6 }
  0x62   :  { %331 = vmatprep.subr.bf16.mxu0 %v1160_v7 }
  0x65   :  { %332 = vmatpush1.bf16.msra.mxu0 %v1164_v8 }
  0x66   :  { %333 = vmatprep.subr.bf16.mxu0 %v1168_v9 }
  0x69   :  { %334 = vmatpush1.bf16.msra.mxu0 %v1172_v10 }
  0x6a   :  { %335 = vmatprep.subr.bf16.mxu0 %v1176_v11 }
  0x6d   :  { %336 = vmatpush1.bf16.msra.mxu0 %v1180_v12 }
  0x6e   :  { %337 = vmatprep.subr.bf16.mxu0 %v1184_v13 }
  0x71   :  { %338 = vmatpush1.bf16.msra.mxu0 %v1188_v14 }
  0x72   :  { %339 = vmatprep.subr.bf16.mxu0 %v1192_v15 }
  0x75   :  { %340 = vmatpush1.bf16.msra.mxu0 %v1196_v16 }
  0x76   :  { %481 = vmatprep.subr.bf16.mxu0 %v1139_v1 }
 0x12b   :  { %v204_v24 = vpop.f32.mrb[0].mxu0 }
 0x12c   :  { %v213_v25 = vadd.f32 %v204_v24, %v85_v22  ;;  %v206_v26 = vpop.f32.mrb[1].mxu0 }
 0x12d   :  { %v208_v27 = vpop.f32.mrb[2].mxu0  ;;  %v214_v34 = vadd.f32 %v206_v26, %v86_v32 }
 0x12e   :  { %v821_v28 = vmul.f32 -1.442695, %v213_v25  ;;  %v215_v29 = vadd.f32 %v208_v27, %v87_v23  ;;  %v210_v30 = vpop.f32.mrb[3].mxu0 }
 0x12f   :  { %v216_v35 = vadd.f32 %v210_v30, %v88_v33 }
 0x130   :  { %868 = vpow2.f32 %v821_v28  ;;  %v822_v31 = vmul.f32 -1.442695, %v215_v29 }
 0x132   :  { %870 = vpow2.f32 %v822_v31 }
 0x133   :  { %872 = vtanh.f32 %v214_v34 }
 0x134   :  { %874 = vtanh.f32 %v216_v35  ;;  %v318_v35 = vld [vmem:[#allocation3 + $0x20] sm:$0xff] }
 0x13a   :  { %v869_v36 = vpop.eup %868 }
 0x13b   :  { %v223_v37 = vadd.f32 1.0, %v869_v36  ;;  %v319_v36 = vld [vmem:[#allocation3 + $0x28] sm:$0xff] }
 0x13c   :  { %v871_v38 = vpop.eup %870 }
 0x13d   :  { %876 = vrcp.f32 %v223_v37  ;;  %v224_v39 = vadd.f32 1.0, %v871_v38  ;;  %v873_v40 = vpop.eup %872  ;;  %v320_v37 = vunpack.c.l.bf16 %v318_v35  ;;  %v322_v38 = vunpack.c.l.bf16 %v319_v36 }
 0x13e   :  { %v875_v41 = vpop.eup %874  ;;  %v231_v42 = vsub.f32 %v873_v40, %v61_v17 }
 0x13f   :  { %878 = vrcp.f32 %v224_v39  ;;  %v232_v44 = vsub.f32 %v875_v41, %v62_v18 }
 0x147   :  { %v877_v43 = vpop.eup %876 }
 0x148   :  { %v233_v45 = vmul.f32 %v877_v43, %v231_v42 }
 0x149   :  { %v879_v46 = vpop.eup %878 }
 0x14a   :  { %v234_v47 = vmul.f32 %v879_v46, %v232_v44  ;;  %v235_v48 = vadd.f32 %v233_v45, %v61_v17  ;;  %v245_v17 = vunpack.c.h.bf16 %v241_v52 }
 0x14c   :  { %v236_v49 = vadd.f32 %v234_v47, %v62_v18  ;;  %237 = vst [vmem:[#allocation9] sm:$0xff] %v235_v48  ;;  %v321_v47 = vunpack.c.h.bf16 %v318_v35 }
 0x14e   :  { %238 = vst [vmem:[#allocation9 + $0x8] sm:$0xff] %v236_v49  ;;  %v246_v50 = vpack.c.bf16 %v236_v49, %v235_v48 }
 0x150   :  { %280 = vmatmul.mubr.bf16.vlgmr.msra.gmra.mrb[0].mxu1 %v246_v50 }
 0x151   :  { %404 = vmatpush1.bf16.msra.mxu1 %v1141_v2  ;;  %435 = vmatprep.mubr.bf16.mxu1 %v1063_v0 }
 0x152   :  { %405 = vmatprep.subr.bf16.mxu1 %v1144_v3 }
 0x155   :  { %406 = vmatpush1.bf16.msra.mxu1 %v1148_v4 }
 0x156   :  { %407 = vmatprep.subr.bf16.mxu1 %v1152_v5 }
 0x159   :  { %408 = vmatpush1.bf16.msra.mxu1 %v1156_v6 }
 0x15a   :  { %409 = vmatprep.subr.bf16.mxu1 %v1160_v7 }
 0x15d   :  { %410 = vmatpush1.bf16.msra.mxu1 %v1164_v8 }
 0x15e   :  { %411 = vmatprep.subr.bf16.mxu1 %v1168_v9 }
 0x161   :  { %412 = vmatpush1.bf16.msra.mxu1 %v1172_v10 }
 0x162   :  { %413 = vmatprep.subr.bf16.mxu1 %v1176_v11 }
 0x165   :  { %414 = vmatpush1.bf16.msra.mxu1 %v1180_v12 }
 0x166   :  { %415 = vmatprep.subr.bf16.mxu1 %v1184_v13 }
 0x169   :  { %416 = vmatpush1.bf16.msra.mxu1 %v1188_v14 }
 0x16a   :  { %417 = vmatprep.subr.bf16.mxu1 %v1192_v15 }
 0x16d   :  { %418 = vmatpush1.bf16.msra.mxu1 %v1196_v16 }
 0x16e   :  { %559 = vmatprep.subr.bf16.mxu1 %v1139_v1 }
 0x223   :  { %v281_v55 = vpop.f32.mrb[0].mxu1 }
 0x224   :  { %v290_v56 = vadd.f32 %v281_v55, %v242_v53  ;;  %v283_v57 = vpop.f32.mrb[1].mxu1 }
 0x225   :  { %v285_v58 = vpop.f32.mrb[2].mxu1  ;;  %v291_v18 = vadd.f32 %v283_v57, %v243_v63 }
 0x226   :  { %v823_v59 = vmul.f32 -1.442695, %v290_v56  ;;  %v292_v60 = vadd.f32 %v285_v58, %v244_v54  ;;  %v287_v61 = vpop.f32.mrb[3].mxu1 }
 0x227   :  { %v293_v19 = vadd.f32 %v287_v61, %v245_v17 }
 0x228   :  { %880 = vpow2.f32 %v823_v59  ;;  %v824_v62 = vmul.f32 -1.442695, %v292_v60 }
 0x22a   :  { %882 = vpow2.f32 %v824_v62 }
 0x22b   :  { %884 = vtanh.f32 %v291_v18 }
 0x22c   :  { %886 = vtanh.f32 %v293_v19  ;;  %v396_v19 = vld [vmem:[#allocation3 + $0x30] sm:$0xff] }
 0x232   :  { %v881_v20 = vpop.eup %880 }
 0x233   :  { %v300_v21 = vadd.f32 1.0, %v881_v20  ;;  %v397_v20 = vld [vmem:[#allocation3 + $0x38] sm:$0xff] }
 0x234   :  { %v883_v22 = vpop.eup %882 }
 0x235   :  { %888 = vrcp.f32 %v300_v21  ;;  %v301_v23 = vadd.f32 1.0, %v883_v22  ;;  %v885_v24 = vpop.eup %884  ;;  %v398_v21 = vunpack.c.l.bf16 %v396_v19  ;;  %v400_v22 = vunpack.c.l.bf16 %v397_v20 }
 0x236   :  { %v887_v25 = vpop.eup %886  ;;  %v308_v26 = vsub.f32 %v885_v24, %v235_v48 }
 0x237   :  { %890 = vrcp.f32 %v301_v23  ;;  %v309_v29 = vsub.f32 %v887_v25, %v236_v49 }
 0x23f   :  { %v889_v27 = vpop.eup %888 }
 0x240   :  { %v310_v28 = vmul.f32 %v889_v27, %v308_v26 }
 0x241   :  { %v891_v30 = vpop.eup %890 }
 0x242   :  { %v311_v31 = vmul.f32 %v891_v30, %v309_v29  ;;  %v312_v32 = vadd.f32 %v310_v28, %v235_v48  ;;  %v323_v48 = vunpack.c.h.bf16 %v319_v36 }
 0x244   :  { %v313_v33 = vadd.f32 %v311_v31, %v236_v49  ;;  %315 = vst [vmem:[#allocation9 + $0x10] sm:$0xff] %v312_v32  ;;  %v399_v31 = vunpack.c.h.bf16 %v396_v19 }
 0x246   :  { %316 = vst [vmem:[#allocation9 + $0x18] sm:$0xff] %v313_v33  ;;  %v324_v34 = vpack.c.bf16 %v313_v33, %v312_v32 }
 0x248   :  { %358 = vmatmul.mubr.bf16.vlgmr.msra.gmra.mrb[4].mxu0 %v324_v34 }
 0x249   :  { %482 = vmatpush1.bf16.msra.mxu0 %v1141_v2  ;;  %513 = vmatprep.mubr.bf16.mxu0 %v1063_v0 }
 0x24a   :  { %483 = vmatprep.subr.bf16.mxu0 %v1144_v3 }
 0x24d   :  { %484 = vmatpush1.bf16.msra.mxu0 %v1148_v4 }
 0x24e   :  { %485 = vmatprep.subr.bf16.mxu0 %v1152_v5 }
 0x251   :  { %486 = vmatpush1.bf16.msra.mxu0 %v1156_v6 }
 0x252   :  { %487 = vmatprep.subr.bf16.mxu0 %v1160_v7 }
 0x255   :  { %488 = vmatpush1.bf16.msra.mxu0 %v1164_v8 }
 0x256   :  { %489 = vmatprep.subr.bf16.mxu0 %v1168_v9 }
 0x259   :  { %490 = vmatpush1.bf16.msra.mxu0 %v1172_v10 }
 0x25a   :  { %491 = vmatprep.subr.bf16.mxu0 %v1176_v11 }
 0x25d   :  { %492 = vmatpush1.bf16.msra.mxu0 %v1180_v12 }
 0x25e   :  { %493 = vmatprep.subr.bf16.mxu0 %v1184_v13 }
 0x261   :  { %494 = vmatpush1.bf16.msra.mxu0 %v1188_v14 }
 0x262   :  { %495 = vmatprep.subr.bf16.mxu0 %v1192_v15 }
 0x265   :  { %496 = vmatpush1.bf16.msra.mxu0 %v1196_v16 }
 0x266   :  { %637 = vmatprep.subr.bf16.mxu0 %v1139_v1 }
 0x31b   :  { %v359_v39 = vpop.f32.mrb[4].mxu0 }
 0x31c   :  { %v368_v40 = vadd.f32 %v359_v39, %v320_v37  ;;  %v361_v41 = vpop.f32.mrb[5].mxu0 }
 0x31d   :  { %v363_v42 = vpop.f32.mrb[6].mxu0  ;;  %v369_v49 = vadd.f32 %v361_v41, %v321_v47 }
 0x31e   :  { %v825_v43 = vmul.f32 -1.442695, %v368_v40  ;;  %v370_v44 = vadd.f32 %v363_v42, %v322_v38  ;;  %v365_v45 = vpop.f32.mrb[7].mxu0 }
 0x31f   :  { %v371_v50 = vadd.f32 %v365_v45, %v323_v48 }
 0x320   :  { %892 = vpow2.f32 %v825_v43  ;;  %v826_v46 = vmul.f32 -1.442695, %v370_v44 }
 0x322   :  { %894 = vpow2.f32 %v826_v46 }
 0x323   :  { %896 = vtanh.f32 %v369_v49  ;;  %v474_v49 = vld [vmem:[#allocation3 + $0x40] sm:$0xff] }
 0x324   :  { %898 = vtanh.f32 %v371_v50  ;;  %v475_v50 = vld [vmem:[#allocation3 + $0x48] sm:$0xff] }
 0x32a   :  { %v893_v51 = vpop.eup %892 }
 0x32b   :  { %v378_v52 = vadd.f32 1.0, %v893_v51  ;;  %v476_v51 = vunpack.c.l.bf16 %v474_v49 }
 0x32c   :  { %v895_v53 = vpop.eup %894 }
 0x32d   :  { %900 = vrcp.f32 %v378_v52  ;;  %v379_v54 = vadd.f32 1.0, %v895_v53  ;;  %v897_v55 = vpop.eup %896  ;;  %v478_v52 = vunpack.c.l.bf16 %v475_v50 }
 0x32e   :  { %v899_v56 = vpop.eup %898  ;;  %v386_v57 = vsub.f32 %v897_v55, %v312_v32 }
 0x32f   :  { %902 = vrcp.f32 %v379_v54  ;;  %v387_v60 = vsub.f32 %v899_v56, %v313_v33 }
 0x337   :  { %v901_v58 = vpop.eup %900 }
 0x338   :  { %v388_v59 = vmul.f32 %v901_v58, %v386_v57 }
 0x339   :  { %v903_v61 = vpop.eup %902 }
 0x33a   :  { %v389_v62 = vmul.f32 %v903_v61, %v387_v60  ;;  %v390_v63 = vadd.f32 %v388_v59, %v312_v32  ;;  %v401_v32 = vunpack.c.h.bf16 %v397_v20  ;;  %v477_v61 = vunpack.c.h.bf16 %v474_v49 }
 0x33c   :  { %v391_v17 = vadd.f32 %v389_v62, %v313_v33  ;;  %393 = vst [vmem:[#allocation9 + $0x20] sm:$0xff] %v390_v63  ;;  %v479_v62 = vunpack.c.h.bf16 %v475_v50 }
 0x33e   :  { %394 = vst [vmem:[#allocation9 + $0x28] sm:$0xff] %v391_v17  ;;  %v402_v18 = vpack.c.bf16 %v391_v17, %v390_v63 }
 0x340   :  { %436 = vmatmul.mubr.bf16.vlgmr.msra.gmra.mrb[4].mxu1 %v402_v18 }
 0x341   :  { %560 = vmatpush1.bf16.msra.mxu1 %v1141_v2  ;;  %591 = vmatprep.mubr.bf16.mxu1 %v1063_v0 }
 0x342   :  { %561 = vmatprep.subr.bf16.mxu1 %v1144_v3 }
 0x345   :  { %562 = vmatpush1.bf16.msra.mxu1 %v1148_v4 }
 0x346   :  { %563 = vmatprep.subr.bf16.mxu1 %v1152_v5 }
 0x349   :  { %564 = vmatpush1.bf16.msra.mxu1 %v1156_v6 }
 0x34a   :  { %565 = vmatprep.subr.bf16.mxu1 %v1160_v7 }
 0x34d   :  { %566 = vmatpush1.bf16.msra.mxu1 %v1164_v8 }
 0x34e   :  { %567 = vmatprep.subr.bf16.mxu1 %v1168_v9 }
 0x351   :  { %568 = vmatpush1.bf16.msra.mxu1 %v1172_v10 }
 0x352   :  { %569 = vmatprep.subr.bf16.mxu1 %v1176_v11 }
 0x355   :  { %570 = vmatpush1.bf16.msra.mxu1 %v1180_v12 }
 0x356   :  { %571 = vmatprep.subr.bf16.mxu1 %v1184_v13 }
 0x359   :  { %572 = vmatpush1.bf16.msra.mxu1 %v1188_v14 }
 0x35a   :  { %573 = vmatprep.subr.bf16.mxu1 %v1192_v15 }
 0x35d   :  { %574 = vmatpush1.bf16.msra.mxu1 %v1196_v16 }
 0x35e   :  { %715 = vmatprep.subr.bf16.mxu1 %v1139_v1 }
 0x413   :  { %v437_v23 = vpop.f32.mrb[4].mxu1 }
 0x414   :  { %v446_v24 = vadd.f32 %v437_v23, %v398_v21  ;;  %v439_v25 = vpop.f32.mrb[5].mxu1 }
 0x415   :  { %v441_v26 = vpop.f32.mrb[6].mxu1  ;;  %v447_v33 = vadd.f32 %v439_v25, %v399_v31 }
 0x416   :  { %v827_v27 = vmul.f32 -1.442695, %v446_v24  ;;  %v448_v28 = vadd.f32 %v441_v26, %v400_v22  ;;  %v443_v29 = vpop.f32.mrb[7].mxu1 }
 0x417   :  { %v449_v34 = vadd.f32 %v443_v29, %v401_v32 }
 0x418   :  { %904 = vpow2.f32 %v827_v27  ;;  %v828_v30 = vmul.f32 -1.442695, %v448_v28 }
 0x41a   :  { %906 = vpow2.f32 %v828_v30 }
 0x41b   :  { %908 = vtanh.f32 %v447_v33 }
 0x41c   :  { %910 = vtanh.f32 %v449_v34 }
 0x422   :  { %v905_v1 = vpop.eup %904 }
 0x423   :  { %v456_v35 = vadd.f32 1.0, %v905_v1 }
 0x424   :  { %v907_v36 = vpop.eup %906 }
 0x425   :  { %912 = vrcp.f32 %v456_v35  ;;  %v457_v37 = vadd.f32 1.0, %v907_v36  ;;  %v909_v38 = vpop.eup %908 }
 0x426   :  { %v911_v39 = vpop.eup %910  ;;  %v464_v40 = vsub.f32 %v909_v38, %v390_v63 }
 0x427   :  { %914 = vrcp.f32 %v457_v37  ;;  %v465_v43 = vsub.f32 %v911_v39, %v391_v17 }
 0x42f   :  { %v913_v41 = vpop.eup %912 }
 0x430   :  { %v466_v42 = vmul.f32 %v913_v41, %v464_v40 }
 0x431   :  { %v915_v44 = vpop.eup %914 }
 0x432   :  { %v467_v45 = vmul.f32 %v915_v44, %v465_v43  ;;  %v468_v46 = vadd.f32 %v466_v42, %v390_v63 }
 0x434   :  { %v469_v47 = vadd.f32 %v467_v45, %v391_v17  ;;  %471 = vst [vmem:[#allocation9 + $0x30] sm:$0xff] %v468_v46 }
 0x436   :  { %472 = vst [vmem:[#allocation9 + $0x38] sm:$0xff] %v469_v47  ;;  %v480_v48 = vpack.c.bf16 %v469_v47, %v468_v46 }
 0x438   :  { %514 = vmatmul.mubr.bf16.vlgmr.msra.gmra.mrb[8].mxu0 %v480_v48  ;;  %v631_v48 = vld [vmem:[#allocation3 + $0x68] sm:$0xff] }
 0x439   :  { %638 = vmatpush1.bf16.msra.mxu0 %v1141_v2  ;;  %669 = vmatprep.mubr.bf16.mxu0 %v1063_v0  ;;  %v634_v50 = vunpack.c.l.bf16 %v631_v48 }
 0x43a   :  { %639 = vmatprep.subr.bf16.mxu0 %v1144_v3 }
 0x43d   :  { %640 = vmatpush1.bf16.msra.mxu0 %v1148_v4 }
 0x43e   :  { %641 = vmatprep.subr.bf16.mxu0 %v1152_v5 }
 0x441   :  { %642 = vmatpush1.bf16.msra.mxu0 %v1156_v6 }
 0x442   :  { %643 = vmatprep.subr.bf16.mxu0 %v1160_v7 }
 0x445   :  { %644 = vmatpush1.bf16.msra.mxu0 %v1164_v8 }
 0x446   :  { %645 = vmatprep.subr.bf16.mxu0 %v1168_v9 }
 0x449   :  { %646 = vmatpush1.bf16.msra.mxu0 %v1172_v10 }
 0x44a   :  { %647 = vmatprep.subr.bf16.mxu0 %v1176_v11 }
 0x44d   :  { %648 = vmatpush1.bf16.msra.mxu0 %v1180_v12 }
 0x44e   :  { %649 = vmatprep.subr.bf16.mxu0 %v1184_v13 }
 0x451   :  { %650 = vmatpush1.bf16.msra.mxu0 %v1188_v14 }
 0x452   :  { %651 = vmatprep.subr.bf16.mxu0 %v1192_v15 }
 0x455   :  { %652 = vmatpush1.bf16.msra.mxu0 %v1196_v16 }
 0x50b   :  { %v515_v53 = vpop.f32.mrb[8].mxu0 }
 0x50c   :  { %v524_v54 = vadd.f32 %v515_v53, %v476_v51  ;;  %v517_v55 = vpop.f32.mrb[9].mxu0 }
 0x50d   :  { %v519_v56 = vpop.f32.mrb[10].mxu0  ;;  %v525_v63 = vadd.f32 %v517_v55, %v477_v61 }
 0x50e   :  { %v829_v57 = vmul.f32 -1.442695, %v524_v54  ;;  %v526_v58 = vadd.f32 %v519_v56, %v478_v52  ;;  %v521_v59 = vpop.f32.mrb[11].mxu0 }
 0x50f   :  { %v527_v17 = vadd.f32 %v521_v59, %v479_v62 }
 0x510   :  { %916 = vpow2.f32 %v829_v57  ;;  %v830_v60 = vmul.f32 -1.442695, %v526_v58 }
 0x512   :  { %918 = vpow2.f32 %v830_v60  ;;  %v635_v60 = vunpack.c.h.bf16 %v631_v48 }
 0x513   :  { %920 = vtanh.f32 %v525_v63 }
 0x514   :  { %922 = vtanh.f32 %v527_v17 }
 0x51a   :  { %v917_v18 = vpop.eup %916 }
 0x51b   :  { %v534_v19 = vadd.f32 1.0, %v917_v18 }
 0x51c   :  { %v919_v20 = vpop.eup %918 }
 0x51d   :  { %924 = vrcp.f32 %v534_v19  ;;  %v535_v21 = vadd.f32 1.0, %v919_v20  ;;  %v921_v22 = vpop.eup %920 }
 0x51e   :  { %v923_v23 = vpop.eup %922  ;;  %v542_v24 = vsub.f32 %v921_v22, %v468_v46 }
 0x51f   :  { %926 = vrcp.f32 %v535_v21  ;;  %v543_v27 = vsub.f32 %v923_v23, %v469_v47 }
 0x527   :  { %v925_v25 = vpop.eup %924 }
 0x528   :  { %v544_v26 = vmul.f32 %v925_v25, %v542_v24 }
 0x529   :  { %v927_v28 = vpop.eup %926 }
 0x52a   :  { %v545_v29 = vmul.f32 %v927_v28, %v543_v27  ;;  %v546_v30 = vadd.f32 %v544_v26, %v468_v46 }
 0x52c   :  { %v547_v31 = vadd.f32 %v545_v29, %v469_v47  ;;  %549 = vst [vmem:[#allocation9 + $0x40] sm:$0xff] %v546_v30  ;;  %v630_v47 = vld [vmem:[#allocation3 + $0x60] sm:$0xff] }
 0x52d   :  { %v632_v49 = vunpack.c.l.bf16 %v630_v47  ;;  %v633_v59 = vunpack.c.h.bf16 %v630_v47 }
 0x52e   :  { %550 = vst [vmem:[#allocation9 + $0x48] sm:$0xff] %v547_v31  ;;  %v558_v32 = vpack.c.bf16 %v547_v31, %v546_v30 }
 0x530   :  { %592 = vmatmul.mubr.bf16.vlgmr.msra.gmra.mrb[8].mxu1 %v558_v32  ;;  %v709_v32 = vld [vmem:[#allocation3 + $0x78] sm:$0xff] }
 0x531   :  { %716 = vmatpush1.bf16.msra.mxu1 %v1141_v2  ;;  %747 = vmatprep.mubr.bf16.mxu1 %v1063_v0  ;;  %v552_v0 = vld [vmem:[#allocation3 + $0x50] sm:$0xff]  ;;  %v553_v2 = vld [vmem:[#allocation3 + $0x58] sm:$0xff] }
 0x532   :  { %717 = vmatprep.subr.bf16.mxu1 %v1144_v3  ;;  %v554_v3 = vunpack.c.l.bf16 %v552_v0 }
 0x535   :  { %718 = vmatpush1.bf16.msra.mxu1 %v1148_v4  ;;  %v556_v4 = vunpack.c.l.bf16 %v553_v2 }
 0x536   :  { %719 = vmatprep.subr.bf16.mxu1 %v1152_v5 }
 0x539   :  { %720 = vmatpush1.bf16.msra.mxu1 %v1156_v6 }
 0x53a   :  { %721 = vmatprep.subr.bf16.mxu1 %v1160_v7 }
 0x53d   :  { %722 = vmatpush1.bf16.msra.mxu1 %v1164_v8 }
 0x53e   :  { %723 = vmatprep.subr.bf16.mxu1 %v1168_v9 }
 0x541   :  { %724 = vmatpush1.bf16.msra.mxu1 %v1172_v10 }
 0x542   :  { %725 = vmatprep.subr.bf16.mxu1 %v1176_v11 }
 0x545   :  { %726 = vmatpush1.bf16.msra.mxu1 %v1180_v12 }
 0x546   :  { %727 = vmatprep.subr.bf16.mxu1 %v1184_v13  ;;  %v555_v13 = vunpack.c.h.bf16 %v552_v0 }
 0x549   :  { %728 = vmatpush1.bf16.msra.mxu1 %v1188_v14  ;;  %v557_v14 = vunpack.c.h.bf16 %v553_v2  ;;  %v712_v2 = vunpack.c.l.bf16 %v709_v32 }
 0x54a   :  { %729 = vmatprep.subr.bf16.mxu1 %v1192_v15 }
 0x54d   :  { %730 = vmatpush1.bf16.msra.mxu1 %v1196_v16 }
 0x603   :  { %v593_v5 = vpop.f32.mrb[8].mxu1 }
 0x604   :  { %v602_v6 = vadd.f32 %v593_v5, %v554_v3  ;;  %v595_v7 = vpop.f32.mrb[9].mxu1 }
 0x605   :  { %v597_v8 = vpop.f32.mrb[10].mxu1  ;;  %v603_v33 = vadd.f32 %v595_v7, %v555_v13 }
 0x606   :  { %v831_v9 = vmul.f32 -1.442695, %v602_v6  ;;  %v604_v10 = vadd.f32 %v597_v8, %v556_v4  ;;  %v599_v11 = vpop.f32.mrb[11].mxu1 }
 0x607   :  { %v605_v15 = vadd.f32 %v599_v11, %v557_v14 }
 0x608   :  { %928 = vpow2.f32 %v831_v9  ;;  %v832_v12 = vmul.f32 -1.442695, %v604_v10 }
 0x60a   :  { %930 = vpow2.f32 %v832_v12  ;;  %v713_v12 = vunpack.c.h.bf16 %v709_v32 }
 0x60b   :  { %932 = vtanh.f32 %v603_v33 }
 0x60c   :  { %934 = vtanh.f32 %v605_v15 }
 0x612   :  { %v929_v16 = vpop.eup %928 }
 0x613   :  { %v612_v34 = vadd.f32 1.0, %v929_v16 }
 0x614   :  { %v931_v1 = vpop.eup %930 }
 0x615   :  { %936 = vrcp.f32 %v612_v34  ;;  %v613_v35 = vadd.f32 1.0, %v931_v1  ;;  %v933_v36 = vpop.eup %932 }
 0x616   :  { %v935_v37 = vpop.eup %934  ;;  %v620_v38 = vsub.f32 %v933_v36, %v546_v30 }
 0x617   :  { %938 = vrcp.f32 %v613_v35  ;;  %v621_v41 = vsub.f32 %v935_v37, %v547_v31 }
 0x61f   :  { %v937_v39 = vpop.eup %936 }
 0x620   :  { %v622_v40 = vmul.f32 %v937_v39, %v620_v38 }
 0x621   :  { %v939_v42 = vpop.eup %938 }
 0x622   :  { %v623_v43 = vmul.f32 %v939_v42, %v621_v41  ;;  %v624_v44 = vadd.f32 %v622_v40, %v546_v30 }
 0x624   :  { %v625_v45 = vadd.f32 %v623_v43, %v547_v31  ;;  %627 = vst [vmem:[#allocation9 + $0x50] sm:$0xff] %v624_v44  ;;  %v708_v31 = vld [vmem:[#allocation3 + $0x70] sm:$0xff] }
 0x625   :  { %v710_v0 = vunpack.c.l.bf16 %v708_v31  ;;  %v711_v11 = vunpack.c.h.bf16 %v708_v31 }
 0x626   :  { %628 = vst [vmem:[#allocation9 + $0x58] sm:$0xff] %v625_v45  ;;  %v636_v46 = vpack.c.bf16 %v625_v45, %v624_v44 }
 0x628   :  { %670 = vmatmul.mubr.bf16.vlgmr.msra.gmra.mrb[12].mxu0 %v636_v46 }
 0x6fb   :  { %v671_v51 = vpop.f32.mrb[12].mxu0 }
 0x6fc   :  { %v680_v52 = vadd.f32 %v671_v51, %v632_v49  ;;  %v673_v53 = vpop.f32.mrb[13].mxu0 }
 0x6fd   :  { %v675_v54 = vpop.f32.mrb[14].mxu0  ;;  %v681_v61 = vadd.f32 %v673_v53, %v633_v59 }
 0x6fe   :  { %v833_v55 = vmul.f32 -1.442695, %v680_v52  ;;  %v682_v56 = vadd.f32 %v675_v54, %v634_v50  ;;  %v677_v57 = vpop.f32.mrb[15].mxu0 }
 0x6ff   :  { %v683_v62 = vadd.f32 %v677_v57, %v635_v60 }
 0x700   :  { %940 = vpow2.f32 %v833_v55  ;;  %v834_v58 = vmul.f32 -1.442695, %v682_v56 }
 0x702   :  { %942 = vpow2.f32 %v834_v58 }
 0x703   :  { %944 = vtanh.f32 %v681_v61 }
 0x704   :  { %946 = vtanh.f32 %v683_v62 }
 0x70a   :  { %v941_v63 = vpop.eup %940 }
 0x70b   :  { %v690_v17 = vadd.f32 1.0, %v941_v63 }
 0x70c   :  { %v943_v18 = vpop.eup %942 }
 0x70d   :  { %948 = vrcp.f32 %v690_v17  ;;  %v691_v19 = vadd.f32 1.0, %v943_v18  ;;  %v945_v20 = vpop.eup %944 }
 0x70e   :  { %v947_v21 = vpop.eup %946  ;;  %v698_v22 = vsub.f32 %v945_v20, %v624_v44 }
 0x70f   :  { %950 = vrcp.f32 %v691_v19  ;;  %v699_v25 = vsub.f32 %v947_v21, %v625_v45 }
 0x717   :  { %v949_v23 = vpop.eup %948 }
 0x718   :  { %v700_v24 = vmul.f32 %v949_v23, %v698_v22 }
 0x719   :  { %v951_v26 = vpop.eup %950 }
 0x71a   :  { %v701_v27 = vmul.f32 %v951_v26, %v699_v25  ;;  %v702_v28 = vadd.f32 %v700_v24, %v624_v44 }
 0x71c   :  { %v703_v29 = vadd.f32 %v701_v27, %v625_v45  ;;  %705 = vst [vmem:[#allocation9 + $0x60] sm:$0xff] %v702_v28 }
 0x71e   :  { %706 = vst [vmem:[#allocation9 + $0x68] sm:$0xff] %v703_v29  ;;  %v714_v30 = vpack.c.bf16 %v703_v29, %v702_v28 }
 0x720   :  { %748 = vmatmul.mubr.bf16.vlgmr.msra.gmra.mrb[12].mxu1 %v714_v30 }
 0x7f3   :  { %v749_v3 = vpop.f32.mrb[12].mxu1 }
 0x7f4   :  { %v758_v4 = vadd.f32 %v749_v3, %v710_v0  ;;  %v751_v5 = vpop.f32.mrb[13].mxu1 }
 0x7f5   :  { %v753_v6 = vpop.f32.mrb[14].mxu1  ;;  %v759_v13 = vadd.f32 %v751_v5, %v711_v11 }
 0x7f6   :  { %v835_v7 = vmul.f32 -1.442695, %v758_v4  ;;  %v760_v8 = vadd.f32 %v753_v6, %v712_v2  ;;  %v755_v9 = vpop.f32.mrb[15].mxu1 }
 0x7f7   :  { %v761_v14 = vadd.f32 %v755_v9, %v713_v12 }
 0x7f8   :  { %952 = vpow2.f32 %v835_v7  ;;  %v836_v10 = vmul.f32 -1.442695, %v760_v8 }
 0x7fa   :  { %954 = vpow2.f32 %v836_v10 }
 0x7fb   :  { %956 = vtanh.f32 %v759_v13 }
 0x7fc   :  { %958 = vtanh.f32 %v761_v14 }
 0x802   :  { %v953_v33 = vpop.eup %952 }
 0x803   :  { %v768_v15 = vadd.f32 1.0, %v953_v33 }
 0x804   :  { %v955_v16 = vpop.eup %954 }
 0x805   :  { %960 = vrcp.f32 %v768_v15  ;;  %v769_v34 = vadd.f32 1.0, %v955_v16  ;;  %v957_v1 = vpop.eup %956 }
 0x806   :  { %v959_v35 = vpop.eup %958  ;;  %v776_v36 = vsub.f32 %v957_v1, %v702_v28 }
 0x807   :  { %962 = vrcp.f32 %v769_v34  ;;  %v777_v39 = vsub.f32 %v959_v35, %v703_v29 }
 0x80f   :  { %v961_v37 = vpop.eup %960 }
 0x810   :  { %v778_v38 = vmul.f32 %v961_v37, %v776_v36 }
 0x811   :  { %v963_v40 = vpop.eup %962 }
 0x812   :  { %v780_v41 = vadd.f32 %v778_v38, %v702_v28  ;;  %v779_v42 = vmul.f32 %v963_v40, %v777_v39 }
 0x814   :  { %783 = vst [vmem:[#allocation9 + $0x70] sm:$0xff] %v780_v41  ;;  %v781_v43 = vadd.f32 %v779_v42, %v703_v29 }
 0x816   :  { %784 = vst [vmem:[#allocation9 + $0x78] sm:$0xff] %v781_v43 }
 0x817   :  { %1041 = shalt.err (!%p1038_p0)
}
 0x818   :  { %s1042_s27 = scalar_lea.hbm %s1323_s3, 2048 }
 0x819   :  { %p1043_p1 = scmp.ne.s32.totalorder %s1323_s3, %s1042_s27  ;;  %p1046_p2 = scmp.lt.u32.totalorder %s1042_s27, %s1323_s3 }
 0x81b   :  { %p1048_p3 = pnand %p1046_p2, %p1043_p1 }
 0x81d   :  { %1051 = shalt.err (!%p1048_p3)
}
 0x81e   :  { %798 = dma.vmem_to_hbm [thread:$0]  %s793_s21, 2048, %s1323_s3, [#allocation5], %s1060_s24, %s1060_s24, %s1061_s25  }
 0x81f   :  { %1056 = dma.done.wait [#allocation5], 2048  }
 0x820   :  { %1057 = vsyncadd [#allocation5], 4294965248 }
 0x821   :  { %802 = vsyncpa [#allocation4], 1 }
 0x822   :  { %803 = vsyncpa [#allocation7], 1 }
 0x823   :  { %804 = vsyncpa [#allocation5], 1 }

</bundles_post_ra>
